<compile_context>
chip_gen: v7x
topology: tpu7x:2x2x1
jax: 0.10.0
libtpu: 0.0.40
codegen_flags: <defaults>
</compile_context>

<pallas_src>
import functools

import jax
import jax.numpy as jnp
import numpy as np
from jax.experimental import pallas as pl
from jax.experimental.pallas import tpu as pltpu


def st_gcn_kernel(x_ref, w_ref, b_ref, wt_ref, o_ref, *, T):
    """Whole batch in one program.

    x_ref : (N*T, V*Cin)        bf16, frames x (node, channel), lane-dense
    w_ref : (V*Cin, 2*V*Cout)   bf16, [fused GCN*A*BN1 | block-diag residual*BN]
    b_ref : (1, 2*V*Cout)       f32, fused biases (all BN shifts / conv biases folded)
    wt_ref: (V*Cout, kt*V*Cout) bf16, kt temporal taps concatenated along outputs, BN2 folded
    o_ref : (N*T, V*Cout)       f32
    """
    NT, VC = o_ref.shape
    kt = wt_ref.shape[1] // VC
    pad = (kt - 1) // 2

    # GCN (1x1 conv + adjacency + BN1) and the residual 1x1-conv branch in ONE bf16 MXU
    # matmul; f32 accumulation and f32 element-wise math (bias / ReLU / accumulate).
    y = jnp.dot(x_ref[...], w_ref[...], preferred_element_type=jnp.float32) + b_ref[...]
    h = jnp.maximum(y[:, :VC], 0.0)       # BN1 (folded) -> ReLU          (tcn front half)
    acc = y[:, VC:]                       # residual branch + all remaining per-channel shifts

    # All kt temporal taps in ONE matmul; per-tap 256-lane slices are 128-aligned (free).
    p = jnp.dot(h.astype(wt_ref.dtype), wt_ref[...], preferred_element_type=jnp.float32)

    # Temporal shift with zero padding at the sequence edges: XLU sublane roll + row mask.
    # The mask (on the within-sample frame index) also zeroes the rows the roll wrapped
    # across sample boundaries, so no frame leaks between samples.
    row = jax.lax.broadcasted_iota(jnp.int32, (NT, 1), 0)
    tmod = (row & (T - 1)) if (T & (T - 1)) == 0 else (row % T)   # within-sample frame index
    for dt in range(kt):                  # static unroll, kt == 3
        tap = p[:, dt * VC:(dt + 1) * VC]
        delta = dt - pad
        if delta == 0:
            acc = acc + tap
        else:
            rolled = pltpu.roll(tap, shift=(-delta) % NT, axis=0)  # rolled[r] = tap[r+delta]
            valid = (tmod < T - delta) if delta > 0 else (tmod >= -delta)
            acc = acc + jnp.where(valid, rolled, 0.0)

    # nn.Dropout(p=0) == identity.
    o_ref[...] = jnp.maximum(acc, 0.0)    # final ReLU, lane-dense 256-wide f32 store


def st_gcn_prepare(A, params):
    """One-time weight fusion: adjacency contraction, eval-mode BN folds, bias folds,
    block-diagonal expansion over graph nodes, bf16 cast.  Cache the result across calls."""
    K, V, _ = A.shape
    Cin, Cout = params['wr'].shape
    kt = params['wt'].shape[0]
    VCin, VC = V * Cin, V * Cout

    s1, h1 = params['s1'], params['h1']
    s2, h2 = params['s2'], params['h2']
    sr, hr = params['sr'], params['hr']
    s1t = jnp.tile(s1, V)
    eyeV = jnp.eye(V, dtype=jnp.float32)

    # GCN: W_gcn[(v,i),(w,o)] = sum_k A[k,v,w] * wg[k,i,o], BN1 scale folded in.
    Wg = jnp.einsum('kvw,kio->viwo', A, params['wg']).reshape(VCin, VC) * s1t[None, :]
    bg = jnp.einsum('kw,ko->wo', jnp.sum(A, axis=1), params['bg']).reshape(VC)
    bg = bg * s1t + jnp.tile(h1, V)

    # Residual 1x1 conv + BN, block-diagonal over nodes.  The temporal-conv bias and the BN2
    # shift are added after the temporal taps, so they are folded into this bias as well.
    Wr = jnp.einsum('vw,io->viwo', eyeV, params['wr'] * sr[None, :]).reshape(VCin, VC)
    br = jnp.tile(params['br'] * sr + hr + params['bt'] * s2 + h2, V)

    W_full = jnp.concatenate([Wg, Wr], axis=1).astype(jnp.bfloat16)    # (VCin, 2*VC)
    b_full = jnp.concatenate([bg, br])[None, :].astype(jnp.float32)    # (1, 2*VC)

    # Temporal taps: BN2 scale folded, block-diag over nodes, concatenated along outputs so
    # the kernel needs a single (VC, kt*VC) matmul instead of kt small ones.
    wt_f = params['wt'] * s2[None, None, :]                            # (kt, Cout, Cout)
    wt_bd = jnp.einsum('vw,dco->dvcwo', eyeV, wt_f).reshape(kt, VC, VC)
    Wt_cat = jnp.transpose(wt_bd, (1, 0, 2)).reshape(VC, kt * VC).astype(jnp.bfloat16)

    return {'W_full': W_full, 'b_full': b_full, 'Wt_cat': Wt_cat}


@jax.jit
def _st_gcn_apply(x_nctv, W_full, b_full, Wt_cat):
    N, Cin, T, V = x_nctv.shape
    VCin = V * Cin
    VC = W_full.shape[1] // 2
    Cout = VC // V
    NT = N * T

    # Lane-dense input slab: (N, Cin, T, V) -> (N*T, V*Cin), channel fastest within a node.
    x2d = jnp.transpose(x_nctv, (0, 2, 3, 1)).reshape(NT, VCin).astype(jnp.bfloat16)

    # Single program: whole batch + all fused bf16 weights (~0.5 MB) resident in VMEM.
    out2d = pl.pallas_call(
        functools.partial(st_gcn_kernel, T=T),
        out_shape=jax.ShapeDtypeStruct((NT, VC), jnp.float32),
        in_specs=[pl.BlockSpec(memory_space=pltpu.MemorySpace.VMEM)] * 4,
        out_specs=pl.BlockSpec(memory_space=pltpu.MemorySpace.VMEM),
    )(x2d, W_full, b_full, Wt_cat)

    return out2d.reshape(N, T, V, Cout).transpose(0, 3, 1, 2)   # back to (N, Cout, T, V)


def st_gcn_forward(x_nctv, A, fused):
    """PyTorch-convention forward: (x (N,Cin,T,V), A) -> (out (N,Cout,T,V), A)."""
    out = _st_gcn_apply(x_nctv, fused['W_full'], fused['b_full'], fused['Wt_cat'])
    return out, A


def st_gcn_reference(x, A, p):
    """Pure-JAX NCHW reference mirroring the PyTorch forward (eval-mode BN)."""
    N, Cin, T, V = x.shape
    kt = p['wt'].shape[0]
    pad = (kt - 1) // 2
    # gcn: 1x1 conv then einsum('nkctv,kvw->nctw')
    y = jnp.einsum('kio,nitv->nkotv', p['wg'], x) + p['bg'][None, :, :, None, None]
    z = jnp.einsum('nkctv,kvw->nctw', y, A)
    # tcn
    z = z * p['s1'][None, :, None, None] + p['h1'][None, :, None, None]
    z = jnp.maximum(z, 0.0)
    zp = jnp.pad(z, ((0, 0), (0, 0), (pad, pad), (0, 0)))
    t = sum(jnp.einsum('co,nctv->notv', p['wt'][dt], zp[:, :, dt:dt + T, :])
            for dt in range(kt))
    t = t + p['bt'][None, :, None, None]
    t = t * p['s2'][None, :, None, None] + p['h2'][None, :, None, None]
    # residual (conv 1x1 + BN, since in_channels != out_channels)
    res = jnp.einsum('io,nitv->notv', p['wr'], x) + p['br'][None, :, None, None]
    res = res * p['sr'][None, :, None, None] + p['hr'][None, :, None, None]
    return jnp.maximum(t + res, 0.0), A


def make_params(key, Cin, Cout, K, kt, eps=1e-5):
    ks = jax.random.split(key, 18)

    def bn_fold(kg, kb, km, kv):
        gamma = 1.0 + 0.1 * jax.random.normal(kg, (Cout,), jnp.float32)
        beta = 0.1 * jax.random.normal(kb, (Cout,), jnp.float32)
        rmean = 0.1 * jax.random.normal(km, (Cout,), jnp.float32)
        rvar = jax.random.uniform(kv, (Cout,), jnp.float32, 0.5, 1.5)
        scale = gamma / jnp.sqrt(rvar + eps)
        shift = beta - rmean * scale
        return scale, shift

    s1, h1 = bn_fold(ks[0], ks[1], ks[2], ks[3])     # BN after gcn
    s2, h2 = bn_fold(ks[4], ks[5], ks[6], ks[7])     # BN after temporal conv
    sr, hr = bn_fold(ks[8], ks[9], ks[10], ks[11])   # BN in residual branch
    return {
        'wg': 0.1 * jax.random.normal(ks[12], (K, Cin, Cout), jnp.float32),
        'bg': 0.05 * jax.random.normal(ks[13], (K, Cout), jnp.float32),
        'wt': 0.1 * jax.random.normal(ks[14], (kt, Cout, Cout), jnp.float32),
        'bt': 0.05 * jax.random.normal(ks[15], (Cout,), jnp.float32),
        'wr': 0.1 * jax.random.normal(ks[16], (Cin, Cout), jnp.float32),
        'br': 0.05 * jax.random.normal(ks[17], (Cout,), jnp.float32),
        's1': s1, 'h1': h1, 's2': s2, 'h2': h2, 'sr': sr, 'hr': hr,
    }


if __name__ == "__main__":
    N, Cin, Cout, T, V = 2, 4, 16, 8, 16
    K, kt = 3, 3                       # kernel_size = (3, 3), stride=1, dropout=0, residual=True

    key = jax.random.PRNGKey(0)
    kx, ka, kp = jax.random.split(key, 3)
    x = jax.random.normal(kx, (N, Cin, T, V), jnp.float32)       # (N, C_in, T, V) like PyTorch
    A = 0.3 * jax.random.uniform(ka, (K, V, V), jnp.float32)     # (K, V, V)
    params = make_params(kp, Cin, Cout, K, kt)

    fused = st_gcn_prepare(A, params)          # one-time weight fusion, cached across forwards
    out, A_out = st_gcn_forward(x, A, fused)
    out = jax.block_until_ready(out)

    assert out.shape == (N, Cout, T, V)
    ref, _ = st_gcn_reference(x, A, params)
    np.testing.assert_allclose(np.asarray(out), np.asarray(ref), rtol=1e-2, atol=1e-2)
    print("KERNEL_OK")
</pallas_src>

<mosaic_0001>
module attributes {stable_mosaic.version = 11 : i64} {
  func.func @st_gcn_kernel(%arg0: memref<16x64xbf16, #tpu.memory_space<vmem>>, %arg1: memref<64x512xbf16, #tpu.memory_space<vmem>>, %arg2: memref<1x512xf32, #tpu.memory_space<vmem>>, %arg3: memref<256x768xbf16, #tpu.memory_space<vmem>>, %arg4: memref<16x256xf32, #tpu.memory_space<vmem>>) attributes {dimension_semantics = [], scalar_prefetch = 0 : i64, scratch_operands = 0 : i64, tpu.core_type = #tpu.core_type<tc>} {
    %c0 = arith.constant 0 : index
    %c0_0 = arith.constant 0 : index
    %0 = vector.load %arg0[%c0, %c0_0] : memref<16x64xbf16, #tpu.memory_space<vmem>>, vector<16x64xbf16>
    %c0_1 = arith.constant 0 : index
    %c0_2 = arith.constant 0 : index
    %1 = vector.load %arg1[%c0_1, %c0_2] : memref<64x512xbf16, #tpu.memory_space<vmem>>, vector<64x512xbf16>
    %cst = arith.constant dense<0.000000e+00> : vector<16x512xf32>
    %2 = tpu.matmul %0, %1, %cst {dimension_numbers = #tpu.dot_dimension_numbers<[1], [0], [0], [1], [0, 0, 1, 1], [], []>} : vector<16x64xbf16>, vector<64x512xbf16>, vector<16x512xf32> -> vector<16x512xf32>
    %c0_3 = arith.constant 0 : index
    %c0_4 = arith.constant 0 : index
    %3 = vector.load %arg2[%c0_3, %c0_4] : memref<1x512xf32, #tpu.memory_space<vmem>>, vector<1x512xf32>
    %4 = vector.broadcast %3 : vector<1x512xf32> to vector<16x512xf32>
    %5 = arith.addf %2, %4 : vector<16x512xf32>
    %6 = vector.extract_strided_slice %5 {offsets = [0, 0], sizes = [16, 256], strides = [1, 1]} : vector<16x512xf32> to vector<16x256xf32>
    %cst_5 = arith.constant 0.000000e+00 : f32
    %7 = vector.broadcast %cst_5 : f32 to vector<16x256xf32>
    %8 = arith.maximumf %6, %7 : vector<16x256xf32>
    %9 = vector.extract_strided_slice %5 {offsets = [0, 256], sizes = [16, 256], strides = [1, 1]} : vector<16x512xf32> to vector<16x256xf32>
    %10 = arith.truncf %8 : vector<16x256xf32> to vector<16x256xbf16>
    %c0_6 = arith.constant 0 : index
    %c0_7 = arith.constant 0 : index
    %11 = vector.load %arg3[%c0_6, %c0_7] : memref<256x768xbf16, #tpu.memory_space<vmem>>, vector<256x768xbf16>
    %cst_8 = arith.constant dense<0.000000e+00> : vector<16x768xf32>
    %12 = tpu.matmul %10, %11, %cst_8 {dimension_numbers = #tpu.dot_dimension_numbers<[1], [0], [0], [1], [0, 0, 1, 1], [], []>} : vector<16x256xbf16>, vector<256x768xbf16>, vector<16x768xf32> -> vector<16x768xf32>
    %13 = tpu.iota {dimensions = array<i32: 0>} : vector<16x1xi32>
    %c7_i32 = arith.constant 7 : i32
    %14 = vector.broadcast %c7_i32 : i32 to vector<16x1xi32>
    %15 = arith.andi %13, %14 : vector<16x1xi32>
    %16 = vector.extract_strided_slice %12 {offsets = [0, 0], sizes = [16, 256], strides = [1, 1]} : vector<16x768xf32> to vector<16x256xf32>
    %c1_i32 = arith.constant 1 : i32
    %17 = tpu.dynamic_rotate %16 by %c1_i32 dim 0 : vector<16x256xf32>, i32 -> vector<16x256xf32>
    %c1_i32_9 = arith.constant 1 : i32
    %18 = vector.broadcast %c1_i32_9 : i32 to vector<16x1xi32>
    %19 = arith.cmpi sge, %15, %18 : vector<16x1xi32>
    %cst_10 = arith.constant 0.000000e+00 : f32
    %20 = vector.shape_cast %19 : vector<16x1xi1> to vector<16x1xi1>
    %21 = vector.broadcast %20 : vector<16x1xi1> to vector<16x256xi1>
    %22 = vector.broadcast %cst_10 : f32 to vector<16x256xf32>
    %23 = arith.select %21, %17, %22 : vector<16x256xi1>, vector<16x256xf32>
    %24 = arith.addf %9, %23 : vector<16x256xf32>
    %25 = vector.extract_strided_slice %12 {offsets = [0, 256], sizes = [16, 256], strides = [1, 1]} : vector<16x768xf32> to vector<16x256xf32>
    %26 = arith.addf %24, %25 : vector<16x256xf32>
    %27 = vector.extract_strided_slice %12 {offsets = [0, 512], sizes = [16, 256], strides = [1, 1]} : vector<16x768xf32> to vector<16x256xf32>
    %c15_i32 = arith.constant 15 : i32
    %28 = tpu.dynamic_rotate %27 by %c15_i32 dim 0 : vector<16x256xf32>, i32 -> vector<16x256xf32>
    %c7_i32_11 = arith.constant 7 : i32
    %29 = vector.broadcast %c7_i32_11 : i32 to vector<16x1xi32>
    %30 = arith.cmpi slt, %15, %29 : vector<16x1xi32>
    %cst_12 = arith.constant 0.000000e+00 : f32
    %31 = vector.shape_cast %30 : vector<16x1xi1> to vector<16x1xi1>
    %32 = vector.broadcast %31 : vector<16x1xi1> to vector<16x256xi1>
    %33 = vector.broadcast %cst_12 : f32 to vector<16x256xf32>
    %34 = arith.select %32, %28, %33 : vector<16x256xi1>, vector<16x256xf32>
    %35 = arith.addf %26, %34 : vector<16x256xf32>
    %cst_13 = arith.constant 0.000000e+00 : f32
    %36 = vector.broadcast %cst_13 : f32 to vector<16x256xf32>
    %37 = arith.maximumf %35, %36 : vector<16x256xf32>
    %c0_14 = arith.constant 0 : index
    %c0_15 = arith.constant 0 : index
    %38 = vector.load %arg4[%c0_14, %c0_15] : memref<16x256xf32, #tpu.memory_space<vmem>>, vector<16x256xf32>
    tpu.vector_store %arg4[%c0_14, %c0_15], %37 {strides = array<i32>} : memref<16x256xf32, #tpu.memory_space<vmem>>, vector<16x256xf32>,
    return
  }
}

</mosaic_0001>

<bundles_post_ra>
// kernel: _st_gcn_apply.1
= control target key start
LH: loop header
LB: loop body
LE: loop exit
PB: predicated region body
PF: predicated region fallthrough
CT: control target
= control target key end

     0   :  { %9 = vsyncpa [#allocation3], 0  ;;  %s1350_s15 = smov [#allocation2]   ;;  %s1504_s0 = inlined_call_operand.vmem [shape: bf16[16,64], index: 0, kind: input, shape index: {}]   ;;  %s1505_s1 = inlined_call_operand.vmem [shape: bf16[64,512], index: 1, kind: input, shape index: {}]   ;;  %s1506_s2 = inlined_call_operand.vmem [shape: f32[1,512], index: 2, kind: input, shape index: {}]   ;;  %s1507_s3 = inlined_call_operand.hbm [shape: bf16[256,768], index: 3, kind: input, shape index: {}]   ;;  %s1508_s4 = inlined_call_operand.vmem [shape: f32[16,256], index: 4, kind: output, shape index: {}]  }
   0x1   :  { %s21_s16 = sshll.u32 %s1350_s15, 4  ;;  %s1326_s19 = scalar_lea.hbm %s1507_s3, 12288  ;;  %s22_s16 = int_to_ptr.vmem [resolvable:$true] %s21_s16 }
   0x2   :  { %p1327_p0 = scmp.ne.s32.totalorder %s1507_s3, %s1326_s19  ;;  %p1330_p1 = scmp.lt.u32.totalorder %s1326_s19, %s1507_s3 }
   0x4   :  { %p1332_p2 = pnand %p1330_p1, %p1327_p0 }
   0x6   :  { %1335 = shalt.err (!%p1332_p2)
}
   0x7   :  { %s1336_s24 = scalar_lea.vmem %s22_s16, 12288  ;;  %p1341_p4 = scmp.lt.s32.totalorder %s22_s16, %s22_s16 }
   0x8   :  { %p1337_p3 = scmp.ne.s32.totalorder %s22_s16, %s1336_s24  ;;  %p1342_p5 = scmp.lt.s32.totalorder %s1336_s24, %s1336_s24 }
   0xa   :  { %p1343_p6 = por %p1342_p5, %p1341_p4 }
   0xc   :  { %p1344_p7 = pnand %p1343_p6, %p1337_p3 }
   0xe   :  { %1347 = shalt.err (!%p1344_p7)
}
   0xf   :  { %s1351_s25 = smov 384   ;;  %s1352_s26 = smov 24  }
  0x10   :  { %27 = dma.hbm_to_vmem [thread:$0]  %s1507_s3, 12288, %s22_s16, [#allocation3], %s1351_s25, %s1351_s25, %s1352_s26  }
  0x11   :  { %1348 = dma.done.wait [#allocation3], 12288  }
  0x12   :  { %1349 = vsyncadd [#allocation3], 4294955008  ;;  %v1353_v0 = vmov 0   ;;  %v1157_v1 = vld [vmem:[%s1505_s1 + $0x4] ss:$16 sps:$4 sm:$0xff]   ;;  %vm157_vm0 = vcmask 523264  }
  0x13   :  { %193 = vmatprep.mubr.bf16.mxu1 %v1353_v0  ;;  %v1159_v2 = vld [vmem:[%s1505_s1] ss:$16 sps:$4 sm:$0xff]   ;;  %161 = vmatprep.subr.bf16.mxu1 %v1157_v1  ;;  %v1160_v3 = vld [vmem:[%s1505_s1 + $0x24] ss:$16 sps:$4 sm:$0xff]   ;;  %v1172_v9 = vld [vmem:[%s1505_s1 + $0xc] ss:$16 sps:$4 sm:$0xff]  }
  0x14   :  { %162 = vmatpush1.bf16.msra.mxu1 %v1159_v2  ;;  %v1162_v4 = vld [vmem:[%s1505_s1 + $0x20] ss:$16 sps:$4 sm:$0xff]   ;;  %v1163_v5 = vld [vmem:[%s1505_s1 + $0x44] ss:$16 sps:$4 sm:$0xff]   ;;  %v1170_v13 = vld [vmem:[%s1505_s1 + $0x8] ss:$16 sps:$4 sm:$0xff]  }
  0x15   :  { %163 = vmatprep.subr.bf16.mxu1 %v1160_v3  ;;  %v1165_v6 = vld [vmem:[%s1505_s1 + $0x40] ss:$16 sps:$4 sm:$0xff]   ;;  %v1166_v7 = vld [vmem:[%s1505_s1 + $0x64] ss:$16 sps:$4 sm:$0xff]   ;;  %v1175_v15 = vld [vmem:[%s1505_s1 + $0x2c] ss:$16 sps:$4 sm:$0xff]  }
  0x16   :  { %v1168_v8 = vld [vmem:[%s1505_s1 + $0x60] ss:$16 sps:$4 sm:$0xff]   ;;  %v1182_v10 = vld [vmem:[#allocation2 + $0x4] ss:$24 sps:$4 sm:$0xff]   ;;  %v1188_v14 = vld [vmem:[#allocation2 + $0x34] ss:$24 sps:$4 sm:$0xff]  }
  0x17   :  { %v1184_v11 = vld [vmem:[#allocation2] ss:$24 sps:$4 sm:$0xff]   ;;  %829 = vmatprep.subr.bf16.mxu0 %v1182_v10  ;;  %v1190_v16 = vld [vmem:[#allocation2 + $0x30] ss:$24 sps:$4 sm:$0xff]   ;;  %v1194_v17 = vld [vmem:[#allocation2 + $0x64] ss:$24 sps:$4 sm:$0xff]  }
  0x18   :  { %164 = vmatpush1.bf16.msra.mxu1 %v1162_v4  ;;  %v1169_v12 = vld [vmem:[%s1504_s0] sm:$0xff]   ;;  %830 = vmatpush1.bf16.msra.mxu0 %v1184_v11  ;;  %v1173_v18 = vld [vmem:[%s1505_s1 + $0x28] ss:$16 sps:$4 sm:$0xff]   ;;  %v1178_v19 = vld [vmem:[%s1505_s1 + $0x4c] ss:$16 sps:$4 sm:$0xff]  }
  0x19   :  { %165 = vmatprep.subr.bf16.mxu1 %v1163_v5  ;;  %831 = vmatprep.subr.bf16.mxu0 %v1188_v14  ;;  %v1196_v20 = vld [vmem:[#allocation2 + $0x60] ss:$24 sps:$4 sm:$0xff]   ;;  %v1200_v21 = vld [vmem:[#allocation2 + $0x94] ss:$24 sps:$4 sm:$0xff]   ;;  %v1202_v24 = vld [vmem:[#allocation2 + $0x90] ss:$24 sps:$4 sm:$0xff]  }
  0x1a   :  { %v1176_v22 = vld [vmem:[%s1505_s1 + $0x48] ss:$16 sps:$4 sm:$0xff]   ;;  %v1181_v23 = vld [vmem:[%s1505_s1 + $0x6c] ss:$16 sps:$4 sm:$0xff]  }
  0x1b   :  { %v1206_v25 = vld [vmem:[#allocation2 + $0xc4] ss:$24 sps:$4 sm:$0xff]   ;;  %v1179_v26 = vld [vmem:[%s1505_s1 + $0x68] ss:$16 sps:$4 sm:$0xff]   ;;  %v1212_v29 = vld [vmem:[#allocation2 + $0xf4] ss:$24 sps:$4 sm:$0xff]  }
  0x1c   :  { %166 = vmatpush1.bf16.msra.mxu1 %v1165_v6  ;;  %832 = vmatpush1.bf16.msra.mxu0 %v1190_v16  ;;  %v1187_v27 = vld [vmem:[#allocation2 + $0xc] ss:$24 sps:$4 sm:$0xff]   ;;  %v1208_v28 = vld [vmem:[#allocation2 + $0xc0] ss:$24 sps:$4 sm:$0xff]   ;;  %v1193_v31 = vld [vmem:[#allocation2 + $0x3c] ss:$24 sps:$4 sm:$0xff]  }
  0x1d   :  { %167 = vmatprep.subr.bf16.mxu1 %v1166_v7  ;;  %833 = vmatprep.subr.bf16.mxu0 %v1194_v17  ;;  %v1185_v30 = vld [vmem:[#allocation2 + $0x8] ss:$24 sps:$4 sm:$0xff]   ;;  %v1218_v33 = vld [vmem:[#allocation2 + $0x124] ss:$24 sps:$4 sm:$0xff]   ;;  %v1191_v34 = vld [vmem:[#allocation2 + $0x38] ss:$24 sps:$4 sm:$0xff]  }
  0x1e   :  { %v1214_v32 = vld [vmem:[#allocation2 + $0xf0] ss:$24 sps:$4 sm:$0xff]   ;;  %v1199_v35 = vld [vmem:[#allocation2 + $0x6c] ss:$24 sps:$4 sm:$0xff]   ;;  %v1220_v36 = vld [vmem:[#allocation2 + $0x120] ss:$24 sps:$4 sm:$0xff]  }
  0x1f   :  { %v1224_v37 = vld [vmem:[#allocation2 + $0x154] ss:$24 sps:$4 sm:$0xff]   ;;  %v1197_v38 = vld [vmem:[#allocation2 + $0x68] ss:$24 sps:$4 sm:$0xff]   ;;  %v1230_v41 = vld [vmem:[#allocation2 + $0x184] ss:$24 sps:$4 sm:$0xff]  }
  0x20   :  { %168 = vmatpush1.bf16.msra.mxu1 %v1168_v8  ;;  %834 = vmatpush1.bf16.msra.mxu0 %v1196_v20  ;;  %v1205_v39 = vld [vmem:[#allocation2 + $0x9c] ss:$24 sps:$4 sm:$0xff]   ;;  %v1226_v40 = vld [vmem:[#allocation2 + $0x150] ss:$24 sps:$4 sm:$0xff]   ;;  %v1211_v43 = vld [vmem:[#allocation2 + $0xcc] ss:$24 sps:$4 sm:$0xff]  }
  0x21   :  { %204 = vmatprep.subr.bf16.mxu1 %v1172_v9  ;;  %835 = vmatprep.subr.bf16.mxu0 %v1200_v21  ;;  %v1203_v42 = vld [vmem:[#allocation2 + $0x98] ss:$24 sps:$4 sm:$0xff]   ;;  %v1236_v45 = vld [vmem:[#allocation2 + $0x1b4] ss:$24 sps:$4 sm:$0xff]   ;;  %v1209_v46 = vld [vmem:[#allocation2 + $0xc8] ss:$24 sps:$4 sm:$0xff]  }
  0x22   :  { %v1232_v44 = vld [vmem:[#allocation2 + $0x180] ss:$24 sps:$4 sm:$0xff]   ;;  %v1217_v47 = vld [vmem:[#allocation2 + $0xfc] ss:$24 sps:$4 sm:$0xff]   ;;  %v1238_v48 = vld [vmem:[#allocation2 + $0x1b0] ss:$24 sps:$4 sm:$0xff]  }
  0x23   :  { %1043 = vmatmul.mubr.msk.bf16.vlgmr.msra.gmra.mrb[0].mxu1 %vm157_vm0, %v1169_v12  ;;  %v1215_v49 = vld [vmem:[#allocation2 + $0xf8] ss:$24 sps:$4 sm:$0xff]   ;;  %v1242_v50 = vld [vmem:[#allocation2 + $0x1e4] ss:$24 sps:$4 sm:$0xff]   ;;  %v1248_v53 = vld [vmem:[#allocation2 + $0x214] ss:$24 sps:$4 sm:$0xff]  }
  0x24   :  { %205 = vmatpush1.bf16.msra.mxu1 %v1170_v13  ;;  %236 = vmatprep.mubr.bf16.mxu1 %v1353_v0  ;;  %v1223_v51 = vld [vmem:[#allocation2 + $0x12c] ss:$24 sps:$4 sm:$0xff]   ;;  %v1244_v52 = vld [vmem:[#allocation2 + $0x1e0] ss:$24 sps:$4 sm:$0xff]   ;;  %v1229_v55 = vld [vmem:[#allocation2 + $0x15c] ss:$24 sps:$4 sm:$0xff]  }
  0x25   :  { %206 = vmatprep.subr.bf16.mxu1 %v1175_v15  ;;  %836 = vmatpush1.bf16.msra.mxu0 %v1202_v24  ;;  %v1221_v54 = vld [vmem:[#allocation2 + $0x128] ss:$24 sps:$4 sm:$0xff]   ;;  %v1254_v57 = vld [vmem:[#allocation2 + $0x244] ss:$24 sps:$4 sm:$0xff]   ;;  %v1227_v58 = vld [vmem:[#allocation2 + $0x158] ss:$24 sps:$4 sm:$0xff]  }
  0x26   :  { %837 = vmatprep.subr.bf16.mxu0 %v1206_v25  ;;  %v1250_v56 = vld [vmem:[#allocation2 + $0x210] ss:$24 sps:$4 sm:$0xff]   ;;  %v1235_v59 = vld [vmem:[#allocation2 + $0x18c] ss:$24 sps:$4 sm:$0xff]   ;;  %v1256_v60 = vld [vmem:[#allocation2 + $0x240] ss:$24 sps:$4 sm:$0xff]  }
  0x27   :  { %v1260_v61 = vld [vmem:[#allocation2 + $0x274] ss:$24 sps:$4 sm:$0xff]   ;;  %v1233_v62 = vld [vmem:[#allocation2 + $0x188] ss:$24 sps:$4 sm:$0xff]   ;;  %v1239_v1 = vld [vmem:[#allocation2 + $0x1b8] ss:$24 sps:$4 sm:$0xff]  }
  0x28   :  { %207 = vmatpush1.bf16.msra.mxu1 %v1173_v18  ;;  %v1241_v63 = vld [vmem:[#allocation2 + $0x1bc] ss:$24 sps:$4 sm:$0xff]   ;;  %v1262_v0 = vld [vmem:[#allocation2 + $0x270] ss:$24 sps:$4 sm:$0xff]   ;;  %v1247_v2 = vld [vmem:[#allocation2 + $0x1ec] ss:$24 sps:$4 sm:$0xff]  }
  0x29   :  { %208 = vmatprep.subr.bf16.mxu1 %v1178_v19  ;;  %838 = vmatpush1.bf16.msra.mxu0 %v1208_v28  ;;  %v1245_v3 = vld [vmem:[#allocation2 + $0x1e8] ss:$24 sps:$4 sm:$0xff]   ;;  %v1253_v4 = vld [vmem:[#allocation2 + $0x21c] ss:$24 sps:$4 sm:$0xff]   ;;  %v1251_v5 = vld [vmem:[#allocation2 + $0x218] ss:$24 sps:$4 sm:$0xff]   ;;  %v52_v19 = vlaneseq }
  0x2a   :  { %839 = vmatprep.subr.bf16.mxu0 %v1212_v29  ;;  %v1259_v6 = vld [vmem:[#allocation2 + $0x24c] ss:$24 sps:$4 sm:$0xff]   ;;  %v1257_v7 = vld [vmem:[#allocation2 + $0x248] ss:$24 sps:$4 sm:$0xff]   ;;  %v1265_v8 = vld [vmem:[#allocation2 + $0x27c] ss:$24 sps:$4 sm:$0xff]  }
  0x2b   :  { %v1263_v9 = vld [vmem:[#allocation2 + $0x278] ss:$24 sps:$4 sm:$0xff]   ;;  %v1266_v10 = vld [vmem:[#allocation2 + $0x2a4] ss:$24 sps:$4 sm:$0xff]   ;;  %v1269_v13 = vld [vmem:[#allocation2 + $0x2a8] ss:$24 sps:$4 sm:$0xff]  }
  0x2c   :  { %209 = vmatpush1.bf16.msra.mxu1 %v1176_v22  ;;  %v1268_v11 = vld [vmem:[#allocation2 + $0x2a0] ss:$24 sps:$4 sm:$0xff]   ;;  %v1272_v14 = vld [vmem:[#allocation2 + $0x2d4] ss:$24 sps:$4 sm:$0xff]   ;;  %v1274_v15 = vld [vmem:[#allocation2 + $0x2d0] ss:$24 sps:$4 sm:$0xff]  }
  0x2d   :  { %210 = vmatprep.subr.bf16.mxu1 %v1181_v23  ;;  %840 = vmatpush1.bf16.msra.mxu0 %v1214_v32  ;;  %v1277_v16 = vld [vmem:[#allocation2 + $0x2dc] ss:$24 sps:$4 sm:$0xff]   ;;  %v1275_v17 = vld [vmem:[#allocation2 + $0x2d8] ss:$24 sps:$4 sm:$0xff]   ;;  %v1444_v20 = vshrl.u32 %v52_v19, 7 }
  0x2e   :  { %841 = vmatprep.subr.bf16.mxu0 %v1218_v33  ;;  %v1280_v18 = vld [vmem:[#allocation2 + $0x14] ss:$24 sps:$4 sm:$0xff]   ;;  %v1450_v22 = vld [vmem:[%s1506_s2] sm:$0xf] }
  0x2f   :  { %v54_v21 = vsub.s32 0, %v1444_v20  ;;  %v58_v23 = vsub.s32 1, %v1444_v20  ;;  %vm967_vm1 = vcmp.lt.s32.totalorder %v1444_v20, 1  ;;  %vm994_vm4 = vcmp.lt.s32.totalorder %v1444_v20, 7 }
  0x30   :  { %211 = vmatpush1.bf16.msra.mxu1 %v1179_v26 }
  0x31   :  { %872 = vmatprep.subr.bf16.mxu1 %v1187_v27  ;;  %842 = vmatpush1.bf16.msra.mxu0 %v1220_v36  ;;  %v55_v24 = vrot.slane %v1450_v22, %v54_v21  ;;  %v59_v25 = vrot.slane %v1450_v22, %v58_v23 }
  0x32   :  { %843 = vmatprep.subr.bf16.mxu0 %v1224_v37 }
  0x33   :  { %1044 = vmatmul.mubr.msk.bf16.vlgmr.msra.gmra.mrb[4].mxu1 %vm157_vm0, %v1169_v12  ;;  %v1271_v12 = vld [vmem:[#allocation2 + $0x2ac] ss:$24 sps:$4 sm:$0xff]  }
  0x34   :  { %873 = vmatpush1.bf16.msra.mxu1 %v1185_v30 }
  0x35   :  { %874 = vmatprep.subr.bf16.mxu1 %v1193_v31  ;;  %844 = vmatpush1.bf16.msra.mxu0 %v1226_v40  ;;  %v1278_v40 = vld [vmem:[#allocation2 + $0x10] ss:$24 sps:$4 sm:$0xff]  }
  0x36   :  { %845 = vmatprep.subr.bf16.mxu0 %v1230_v41  ;;  %v1283_v41 = vld [vmem:[#allocation2 + $0x44] ss:$24 sps:$4 sm:$0xff]  }
  0x38   :  { %875 = vmatpush1.bf16.msra.mxu1 %v1191_v34 }
  0x39   :  { %876 = vmatprep.subr.bf16.mxu1 %v1199_v35  ;;  %846 = vmatpush1.bf16.msra.mxu0 %v1232_v44  ;;  %v1284_v44 = vld [vmem:[#allocation2 + $0x70] ss:$24 sps:$4 sm:$0xff]  }
  0x3a   :  { %847 = vmatprep.subr.bf16.mxu0 %v1236_v45  ;;  %v1289_v45 = vld [vmem:[#allocation2 + $0xa4] ss:$24 sps:$4 sm:$0xff]  }
  0x3c   :  { %877 = vmatpush1.bf16.msra.mxu1 %v1197_v38 }
  0x3d   :  { %878 = vmatprep.subr.bf16.mxu1 %v1205_v39  ;;  %848 = vmatpush1.bf16.msra.mxu0 %v1238_v48  ;;  %v1290_v48 = vld [vmem:[#allocation2 + $0xd0] ss:$24 sps:$4 sm:$0xff]  }
  0x3e   :  { %849 = vmatprep.subr.bf16.mxu0 %v1242_v50  ;;  %v1293_v50 = vld [vmem:[#allocation2 + $0x100] ss:$24 sps:$4 sm:$0xff]  }
  0x40   :  { %879 = vmatpush1.bf16.msra.mxu1 %v1203_v42  ;;  %v1281_v42 = vld [vmem:[#allocation2 + $0x40] ss:$24 sps:$4 sm:$0xff]  }
  0x41   :  { %880 = vmatprep.subr.bf16.mxu1 %v1211_v43  ;;  %850 = vmatpush1.bf16.msra.mxu0 %v1244_v52  ;;  %v1286_v43 = vld [vmem:[#allocation2 + $0x74] ss:$24 sps:$4 sm:$0xff]   ;;  %v1296_v52 = vld [vmem:[#allocation2 + $0x130] ss:$24 sps:$4 sm:$0xff]  }
  0x42   :  { %851 = vmatprep.subr.bf16.mxu0 %v1248_v53  ;;  %v1301_v53 = vld [vmem:[#allocation2 + $0x164] ss:$24 sps:$4 sm:$0xff]  }
  0x44   :  { %881 = vmatpush1.bf16.msra.mxu1 %v1209_v46  ;;  %v1287_v46 = vld [vmem:[#allocation2 + $0xa0] ss:$24 sps:$4 sm:$0xff]  }
  0x45   :  { %882 = vmatprep.subr.bf16.mxu1 %v1217_v47  ;;  %852 = vmatpush1.bf16.msra.mxu0 %v1250_v56  ;;  %v1292_v47 = vld [vmem:[#allocation2 + $0xd4] ss:$24 sps:$4 sm:$0xff]   ;;  %v1302_v56 = vld [vmem:[#allocation2 + $0x190] ss:$24 sps:$4 sm:$0xff]  }
  0x46   :  { %853 = vmatprep.subr.bf16.mxu0 %v1254_v57  ;;  %v1307_v57 = vld [vmem:[#allocation2 + $0x1c4] ss:$24 sps:$4 sm:$0xff]  }
  0x48   :  { %883 = vmatpush1.bf16.msra.mxu1 %v1215_v49  ;;  %v1295_v49 = vld [vmem:[#allocation2 + $0x104] ss:$24 sps:$4 sm:$0xff]  }
  0x49   :  { %884 = vmatprep.subr.bf16.mxu1 %v1223_v51  ;;  %854 = vmatpush1.bf16.msra.mxu0 %v1256_v60  ;;  %v1298_v51 = vld [vmem:[#allocation2 + $0x134] ss:$24 sps:$4 sm:$0xff]   ;;  %v1308_v60 = vld [vmem:[#allocation2 + $0x1f0] ss:$24 sps:$4 sm:$0xff]  }
  0x4a   :  { %855 = vmatprep.subr.bf16.mxu0 %v1260_v61  ;;  %v1313_v61 = vld [vmem:[#allocation2 + $0x224] ss:$24 sps:$4 sm:$0xff]  }
  0x4c   :  { %885 = vmatpush1.bf16.msra.mxu1 %v1221_v54  ;;  %v1299_v54 = vld [vmem:[#allocation2 + $0x160] ss:$24 sps:$4 sm:$0xff]  }
  0x4d   :  { %886 = vmatprep.subr.bf16.mxu1 %v1229_v55  ;;  %856 = vmatpush1.bf16.msra.mxu0 %v1262_v0  ;;  %v1304_v55 = vld [vmem:[#allocation2 + $0x194] ss:$24 sps:$4 sm:$0xff]   ;;  %v1314_v0 = vld [vmem:[#allocation2 + $0x250] ss:$24 sps:$4 sm:$0xff]  }
  0x4e   :  { %857 = vmatprep.subr.bf16.mxu0 %v1266_v10  ;;  %v961_v10 = vand.u32 7, %v1444_v20 }
  0x50   :  { %887 = vmatpush1.bf16.msra.mxu1 %v1227_v58  ;;  %v1305_v58 = vld [vmem:[#allocation2 + $0x1c0] ss:$24 sps:$4 sm:$0xff]   ;;  %vm1467_vm2 = vcmp.ge.s32.totalorder %v961_v10, 1  ;;  %vm999_vm5 = vcmp.lt.s32.totalorder %v961_v10, 7 }
  0x51   :  { %888 = vmatprep.subr.bf16.mxu1 %v1235_v59  ;;  %858 = vmatpush1.bf16.msra.mxu0 %v1268_v11  ;;  %v1310_v59 = vld [vmem:[#allocation2 + $0x1f4] ss:$24 sps:$4 sm:$0xff]  }
  0x52   :  { %859 = vmatprep.subr.bf16.mxu0 %v1272_v14 }
  0x54   :  { %889 = vmatpush1.bf16.msra.mxu1 %v1233_v62  ;;  %v1311_v62 = vld [vmem:[#allocation2 + $0x220] ss:$24 sps:$4 sm:$0xff]  }
  0x55   :  { %890 = vmatprep.subr.bf16.mxu1 %v1241_v63  ;;  %860 = vmatpush1.bf16.msra.mxu0 %v1274_v15  ;;  %v1316_v63 = vld [vmem:[#allocation2 + $0x254] ss:$24 sps:$4 sm:$0xff]  }
  0x56   :  { %915 = vmatprep.subr.bf16.mxu0 %v1280_v18 }
  0x58   :  { %891 = vmatpush1.bf16.msra.mxu1 %v1239_v1  ;;  %v1319_v1 = vld [vmem:[#allocation2 + $0x284] ss:$24 sps:$4 sm:$0xff]  }
  0x59   :  { %892 = vmatprep.subr.bf16.mxu1 %v1247_v2  ;;  %v1317_v2 = vld [vmem:[#allocation2 + $0x280] ss:$24 sps:$4 sm:$0xff]  }
  0x5c   :  { %893 = vmatpush1.bf16.msra.mxu1 %v1245_v3  ;;  %v1322_v3 = vld [vmem:[#allocation2 + $0x2b4] ss:$24 sps:$4 sm:$0xff]  }
  0x5d   :  { %894 = vmatprep.subr.bf16.mxu1 %v1253_v4  ;;  %v1320_v4 = vld [vmem:[#allocation2 + $0x2b0] ss:$24 sps:$4 sm:$0xff]  }
  0x60   :  { %895 = vmatpush1.bf16.msra.mxu1 %v1251_v5  ;;  %v1325_v5 = vld [vmem:[#allocation2 + $0x2e4] ss:$24 sps:$4 sm:$0xff]  }
  0x61   :  { %896 = vmatprep.subr.bf16.mxu1 %v1259_v6  ;;  %v1323_v6 = vld [vmem:[#allocation2 + $0x2e0] ss:$24 sps:$4 sm:$0xff]  }
  0x64   :  { %897 = vmatpush1.bf16.msra.mxu1 %v1257_v7  ;;  %v960_v7 = vadd.s32 8, %v1444_v20 }
  0x65   :  { %898 = vmatprep.subr.bf16.mxu1 %v1265_v8  ;;  %v62_v8 = vsub.s32 2, %v1444_v20 }
  0x66   :  { %v962_v11 = vand.u32 7, %v960_v7 }
  0x68   :  { %899 = vmatpush1.bf16.msra.mxu1 %v1263_v9  ;;  %v66_v9 = vsub.s32 3, %v1444_v20  ;;  %vm1471_vm3 = vcmp.ge.s32.totalorder %v962_v11, 1  ;;  %vm1000_vm6 = vcmp.lt.s32.totalorder %v962_v11, 7 }
  0x69   :  { %900 = vmatprep.subr.bf16.mxu1 %v1271_v12 }
  0x6a   :  { %v67_v15 = vrot.slane %v1450_v22, %v66_v9 }
  0x6c   :  { %901 = vmatpush1.bf16.msra.mxu1 %v1269_v13  ;;  %v63_v13 = vrot.slane %v1450_v22, %v62_v8 }
  0x6d   :  { %902 = vmatprep.subr.bf16.mxu1 %v1277_v16 }
  0x70   :  { %903 = vmatpush1.bf16.msra.mxu1 %v1275_v17 }
  0xf6   :  { %v195_v26 = vpop.f32.mrb[0].mxu1 }
  0xf7   :  { %v196_v27 = vadd.f32 %v195_v26, %v55_v24  ;;  %v197_v28 = vpop.f32.mrb[1].mxu1 }
  0xf8   :  { %v198_v29 = vadd.f32 %v197_v28, %v59_v25  ;;  %v199_v30 = vpop.f32.mrb[2].mxu1 }
  0xf9   :  { %v200_v31 = vadd.f32 %v199_v30, %v55_v24  ;;  %v201_v32 = vpop.f32.mrb[3].mxu1  ;;  %v247_v34 = vmax.f32 %v196_v27, 0.0 }
  0xfa   :  { %v202_v33 = vadd.f32 %v201_v32, %v59_v25  ;;  %v248_v36 = vmax.f32 %v198_v29, 0.0 }
  0xfb   :  { %v249_v35 = vmax.f32 %v200_v31, 0.0 }
  0xfc   :  { %v250_v37 = vmax.f32 %v202_v33, 0.0 }
  0xfd   :  { %v1455_v38 = vpack.c.bf16 %v249_v35, %v247_v34 }
  0xfe   :  { %v252_v39 = vpack.c.bf16 %v250_v37, %v248_v36 }
 0x100   :  { %861 = vmatprep.mubr.bf16.mxu0 %v252_v39  ;;  %904 = vmatprep.mubr.bf16.mxu1 %v252_v39 }
 0x101   :  { %862 = vmatmul.mubr.bf16.vlgmr.msra.gmra.mrb[0].mxu0 %v1455_v38  ;;  %905 = vmatmul.mubr.bf16.vlgmr.msra.gmra.mrb[4].mxu1 %v1455_v38 }
 0x102   :  { %916 = vmatpush1.bf16.msra.mxu0 %v1278_v40  ;;  %947 = vmatprep.mubr.bf16.mxu0 %v252_v39 }
 0x103   :  { %917 = vmatprep.subr.bf16.mxu0 %v1283_v41 }
 0x106   :  { %918 = vmatpush1.bf16.msra.mxu0 %v1281_v42 }
 0x107   :  { %919 = vmatprep.subr.bf16.mxu0 %v1286_v43 }
 0x10a   :  { %920 = vmatpush1.bf16.msra.mxu0 %v1284_v44 }
 0x10b   :  { %921 = vmatprep.subr.bf16.mxu0 %v1289_v45 }
 0x10e   :  { %922 = vmatpush1.bf16.msra.mxu0 %v1287_v46 }
 0x10f   :  { %923 = vmatprep.subr.bf16.mxu0 %v1292_v47 }
 0x112   :  { %924 = vmatpush1.bf16.msra.mxu0 %v1290_v48 }
 0x113   :  { %925 = vmatprep.subr.bf16.mxu0 %v1295_v49 }
 0x116   :  { %926 = vmatpush1.bf16.msra.mxu0 %v1293_v50 }
 0x117   :  { %927 = vmatprep.subr.bf16.mxu0 %v1298_v51 }
 0x11a   :  { %928 = vmatpush1.bf16.msra.mxu0 %v1296_v52 }
 0x11b   :  { %929 = vmatprep.subr.bf16.mxu0 %v1301_v53 }
 0x11e   :  { %930 = vmatpush1.bf16.msra.mxu0 %v1299_v54 }
 0x11f   :  { %931 = vmatprep.subr.bf16.mxu0 %v1304_v55 }
 0x122   :  { %932 = vmatpush1.bf16.msra.mxu0 %v1302_v56 }
 0x123   :  { %933 = vmatprep.subr.bf16.mxu0 %v1307_v57 }
 0x126   :  { %934 = vmatpush1.bf16.msra.mxu0 %v1305_v58 }
 0x127   :  { %935 = vmatprep.subr.bf16.mxu0 %v1310_v59 }
 0x12a   :  { %936 = vmatpush1.bf16.msra.mxu0 %v1308_v60 }
 0x12b   :  { %937 = vmatprep.subr.bf16.mxu0 %v1313_v61 }
 0x12e   :  { %938 = vmatpush1.bf16.msra.mxu0 %v1311_v62 }
 0x12f   :  { %939 = vmatprep.subr.bf16.mxu0 %v1316_v63 }
 0x132   :  { %940 = vmatpush1.bf16.msra.mxu0 %v1314_v0 }
 0x133   :  { %941 = vmatprep.subr.bf16.mxu0 %v1319_v1 }
 0x136   :  { %942 = vmatpush1.bf16.msra.mxu0 %v1317_v2 }
 0x137   :  { %943 = vmatprep.subr.bf16.mxu0 %v1322_v3 }
 0x13a   :  { %944 = vmatpush1.bf16.msra.mxu0 %v1320_v4 }
 0x13b   :  { %945 = vmatprep.subr.bf16.mxu0 %v1325_v5 }
 0x13e   :  { %946 = vmatpush1.bf16.msra.mxu0 %v1323_v6 }
 0x141   :  { %948 = vmatmul.mubr.bf16.vlgmr.msra.gmra.mrb[4].mxu0 %v1455_v38 }
 0x1d4   :  { %v863_v12 = vpop.f32.mrb[0].mxu0  ;;  %v906_v14 = vpop.f32.mrb[4].mxu1 }
 0x1d5   :  { %v865_v16 = vpop.f32.mrb[1].mxu0  ;;  %v908_v17 = vpop.f32.mrb[5].mxu1  ;;  %v963_v21 = vrot.slane %v863_v12, 7  ;;  %v1141_v28 = vadd.f32 %v906_v14, %v63_v13 }
 0x1d6   :  { %v867_v18 = vpop.f32.mrb[2].mxu0  ;;  %v910_v19 = vpop.f32.mrb[6].mxu1  ;;  %v964_v22 = vrot.slane %v865_v16, 7  ;;  %v1143_v29 = vadd.f32 %v908_v17, %v67_v15 }
 0x1d7   :  { %v965_v23 = vrot.slane %v867_v18, 7  ;;  %v869_v26 = vpop.f32.mrb[3].mxu0  ;;  %v912_v27 = vpop.f32.mrb[7].mxu1  ;;  %v1145_v33 = vadd.f32 %v910_v19, %v63_v13 }
 0x1d8   :  { %v966_v30 = vrot.slane %v869_v26, 7  ;;  %v1147_v34 = vadd.f32 %v912_v27, %v67_v15 }
 0x1d9   :  { %v970_v31 = vsel %vm967_vm1, %v965_v23, %v963_v21  ;;  %v968_v32 = vsel %vm967_vm1, %v963_v21, %v965_v23 }
 0x1da   :  { %v978_v35 = vsel %vm1467_vm2, %v970_v31, 0.0  ;;  %v980_v36 = vsel %vm1471_vm3, %v968_v32, 0.0  ;;  %v971_v37 = vsel %vm967_vm1, %v966_v30, %v964_v22  ;;  %v969_v38 = vsel %vm967_vm1, %v964_v22, %v966_v30 }
 0x1db   :  { %v1142_v39 = vadd.f32 %v1141_v28, %v978_v35  ;;  %v1146_v40 = vadd.f32 %v1145_v33, %v980_v36  ;;  %v979_v41 = vsel %vm1467_vm2, %v971_v37, 0.0  ;;  %v981_v42 = vsel %vm1471_vm3, %v969_v38, 0.0 }
 0x1dc   :  { %v1144_v43 = vadd.f32 %v1143_v29, %v979_v41  ;;  %v1148_v44 = vadd.f32 %v1147_v34, %v981_v42 }
 0x214   :  { %v949_v45 = vpop.f32.mrb[4].mxu0 }
 0x215   :  { %v951_v46 = vpop.f32.mrb[5].mxu0  ;;  %v990_v48 = vrot.slane %v949_v45, 1 }
 0x216   :  { %v953_v47 = vpop.f32.mrb[6].mxu0  ;;  %v991_v51 = vrot.slane %v951_v46, 1 }
 0x217   :  { %v992_v49 = vrot.slane %v953_v47, 1  ;;  %v955_v50 = vpop.f32.mrb[7].mxu0 }
 0x218   :  { %v993_v52 = vrot.slane %v955_v50, 1 }
 0x219   :  { %v995_v53 = vsel %vm994_vm4, %v990_v48, %v992_v49  ;;  %v997_v54 = vsel %vm994_vm4, %v992_v49, %v990_v48 }
 0x21a   :  { %v1005_v55 = vsel %vm999_vm5, %v995_v53, 0.0  ;;  %v1007_v56 = vsel %vm1000_vm6, %v997_v54, 0.0  ;;  %v996_v57 = vsel %vm994_vm4, %v991_v51, %v993_v52  ;;  %v998_v58 = vsel %vm994_vm4, %v993_v52, %v991_v51 }
 0x21b   :  { %v1009_v59 = vadd.f32 %v1142_v39, %v1005_v55  ;;  %v1011_v60 = vadd.f32 %v1146_v40, %v1007_v56  ;;  %v1006_v61 = vsel %vm999_vm5, %v996_v57, 0.0  ;;  %v1008_v62 = vsel %vm1000_vm6, %v998_v58, 0.0 }
 0x21c   :  { %v1010_v63 = vadd.f32 %v1144_v43, %v1006_v61  ;;  %v1012_v0 = vadd.f32 %v1148_v44, %v1008_v62 }
 0x21d   :  { %v1013_v20 = vmax.f32 %v1009_v59, 0.0  ;;  %v1015_v1 = vmax.f32 %v1011_v60, 0.0 }
 0x21e   :  { %v1014_v2 = vmax.f32 %v1010_v63, 0.0  ;;  %v1016_v3 = vmax.f32 %v1012_v0, 0.0 }
 0x21f   :  { %1017 = vst [vmem:[%s1508_s4] sm:$0xff] %v1013_v20  ;;  %1019 = vst [vmem:[%s1508_s4 + $0x10] sm:$0xff] %v1015_v1 }
 0x220   :  { %1018 = vst [vmem:[%s1508_s4 + $0x8] sm:$0xff] %v1014_v2  ;;  %1020 = vst [vmem:[%s1508_s4 + $0x18] sm:$0xff] %v1016_v3 }
 0x221   :  { %1025 = vsyncpa [#allocation3], 1 }

</bundles_post_ra>
